<compile_context>
chip_gen: v7x
topology: tpu7x:2x2x1
jax: 0.10.0
libtpu: 0.0.40
codegen_flags: <defaults>
</compile_context>

<pallas_src>
import jax
import jax.numpy as jnp
import numpy as np
from jax.experimental import pallas as pl
from jax.experimental.pallas import tpu as pltpu


def _round_up(x, m):
    return (x + m - 1) // m * m


# --------------------------------------------------------------------------
# Kernel: three lane-dense MXU matmuls + bias + ReLU (everything else folded)
# --------------------------------------------------------------------------
def image_search_kernel(xi_ref, xk_ref,
                        wa_ref, wb_ref, c1_ref,
                        w2_ref, b2_ref,
                        w3_ref, b3_ref,
                        o_ref):
    # Encoders, 0.95/0.05 scales, global-average pool (1/HW), fc1 and eval-BN1
    # are all folded host-side into (wa, wb, c1).  x_i arrives pre-flattened
    # as (Bt, Cin*HW) and wa is row-replicated over HW, so the pool is part of
    # a single lane-dense K=Cin*HW bf16 matmul with f32 accumulation.
    h = (jnp.dot(xi_ref[...], wa_ref[...], preferred_element_type=jnp.float32)
         + jnp.dot(xk_ref[...], wb_ref[...], preferred_element_type=jnp.float32)
         + c1_ref[...])
    h = jnp.maximum(h, 0.0)                                             # ReLU (f32)

    # fc_module_2 with eval-BN2 folded into (w2, b2).
    h = jnp.dot(h.astype(w2_ref.dtype), w2_ref[...],
                preferred_element_type=jnp.float32) + b2_ref[...]
    h = jnp.maximum(h, 0.0)                                             # ReLU (f32)

    # fc_3; output lane-padded to a multiple of 128 -> unmasked vst.
    out = jnp.dot(h.astype(w3_ref.dtype), w3_ref[...],
                  preferred_element_type=jnp.float32) + b3_ref[...]
    o_ref[...] = out.astype(o_ref.dtype)


# --------------------------------------------------------------------------
# Wrapper
# --------------------------------------------------------------------------
def _choose_block_b(B, target):
    """Whole batch in one step if small; else the largest divisor of B that is
    a multiple of 8 and <= target (so no host-side padding is ever needed).
    On v7x prefer a target giving >=2 grid steps so both TensorCores work."""
    if B <= target:
        return B
    blk = (target // 8) * 8
    while blk >= 8:
        if B % blk == 0:
            return blk
        blk -= 8
    return B


def image_search_forward(x_i, x_k, fused, num_classes, *, block_b_target=256):
    B, Cin, H, W = x_i.shape
    HW = H * W
    CinHW = Cin * HW
    K = x_k.shape[1]
    E = fused["w2"].shape[0]
    Cp = fused["w3"].shape[1]                       # lane-padded class dim

    compute_dtype = fused["wa"].dtype               # bf16 storage for DMA bytes
    xi_flat = x_i.reshape(B, CinHW).astype(compute_dtype)
    xk = x_k.astype(compute_dtype)

    block_b = _choose_block_b(B, block_b_target)
    grid = (B // block_b,)

    def resident(arr):
        # Constant-index weight blocks: stay VMEM-resident, single-buffered
        # (default pipelining would double-buffer them for nothing).
        nd = arr.ndim
        return pl.BlockSpec(arr.shape, lambda i, nd=nd: (0,) * nd,
                            pipeline_mode=pl.Buffered(1))

    weights = (fused["wa"], fused["wb"], fused["c1"],
               fused["w2"], fused["b2"], fused["w3"], fused["b3"])

    # Advisory cost estimate so XLA schedules producers/consumers around us.
    flops = 2 * B * (CinHW * E + K * E + E * E + E * Cp)
    bytes_accessed = (xi_flat.size * xi_flat.dtype.itemsize
                      + xk.size * xk.dtype.itemsize
                      + sum(int(w.size) * w.dtype.itemsize for w in weights)
                      + B * Cp * 4)
    cost = pl.CostEstimate(flops=int(flops), transcendentals=0,
                           bytes_accessed=int(bytes_accessed))

    # VMEM plan: single-buffered resident weights + double-buffered activation
    # tiles + headroom; clamp to 48 MiB so the same budget fits v7x's 64 MiB.
    # At production emb_size re-derive per generation: raise toward ~100 MiB
    # on v5e/v6e (128 MiB physical), keep <= ~56 MiB on v7x, and if w2 [E,E]
    # still does not fit resident, add an 'arbitrary' grid axis tiling w2/w3
    # along the output-N dimension.
    weight_bytes = sum(int(w.size) * w.dtype.itemsize for w in weights)
    act_bytes = 2 * block_b * (CinHW * xi_flat.dtype.itemsize
                               + K * xk.dtype.itemsize
                               + Cp * 4)
    vmem_limit = int(min(max(weight_bytes + act_bytes + (8 << 20), 32 << 20),
                         48 << 20))

    out = pl.pallas_call(
        image_search_kernel,
        out_shape=jax.ShapeDtypeStruct((B, Cp), jnp.float32),
        grid_spec=pltpu.PrefetchScalarGridSpec(
            num_scalar_prefetch=0,
            grid=grid,
            in_specs=[
                pl.BlockSpec((block_b, CinHW), lambda i: (i, 0)),   # x_i tile
                pl.BlockSpec((block_b, K), lambda i: (i, 0)),       # x_k tile
                resident(fused["wa"]),
                resident(fused["wb"]),
                resident(fused["c1"]),
                resident(fused["w2"]),
                resident(fused["b2"]),
                resident(fused["w3"]),
                resident(fused["b3"]),
            ],
            out_specs=pl.BlockSpec((block_b, Cp), lambda i: (i, 0)),
        ),
        compiler_params=pltpu.CompilerParams(
            dimension_semantics=("parallel",),       # megacore sharding on v7x
            vmem_limit_bytes=vmem_limit,
        ),
        cost_estimate=cost,
    )(xi_flat, xk, *weights)

    return out[:, :num_classes]


# --------------------------------------------------------------------------
# Parameters (original module parametrization) + host-side folding
# --------------------------------------------------------------------------
def make_params(key, cin, num_keywords, emb_size, num_classes):
    ks = jax.random.split(key, 18)
    eps = 1e-5

    def lin_w(k, fan_in, fan_out):
        s = 1.0 / np.sqrt(fan_in)
        return jax.random.uniform(k, (fan_in, fan_out), jnp.float32, -s, s)

    def bn(kg, kb, km, kv, n):
        # Full eval BatchNorm1d affine folding: s = gamma/sqrt(var+eps),
        # t = beta - mean*s  (not the gamma=1/beta=0 special case).
        gamma = 1.0 + 0.1 * jax.random.normal(kg, (1, n), jnp.float32)
        beta = 0.1 * jax.random.normal(kb, (1, n), jnp.float32)
        rm = 0.1 * jax.random.normal(km, (1, n), jnp.float32)
        rv = jnp.abs(jax.random.normal(kv, (1, n), jnp.float32)) + 0.5
        s = gamma / jnp.sqrt(rv + eps)
        t = beta - rm * s
        return s, t

    # stand-in encoders (image: GAP + Linear, keyword: Linear)
    wi = lin_w(ks[0], cin, emb_size)
    bi = jax.random.uniform(ks[1], (1, emb_size), jnp.float32, -0.1, 0.1)
    wk = lin_w(ks[2], num_keywords, emb_size)
    bk = jax.random.uniform(ks[3], (1, emb_size), jnp.float32, -0.1, 0.1)

    # fc_module_1: Linear(2E -> E) split into image/keyword halves + BN(eval)
    w1 = lin_w(ks[4], 2 * emb_size, emb_size)
    w1i, w1k = w1[:emb_size], w1[emb_size:]
    b1 = jax.random.uniform(ks[5], (1, emb_size), jnp.float32, -0.1, 0.1)
    s1, t1 = bn(ks[6], ks[7], ks[8], ks[9], emb_size)

    # fc_module_2: Linear(E -> E) + BN(eval)
    w2 = lin_w(ks[10], emb_size, emb_size)
    b2 = jax.random.uniform(ks[11], (1, emb_size), jnp.float32, -0.1, 0.1)
    s2, t2 = bn(ks[12], ks[13], ks[14], ks[15], emb_size)

    # fc_3: Linear(E -> num_classes)
    w3 = lin_w(ks[16], emb_size, num_classes)
    b3 = jax.random.uniform(ks[17], (1, num_classes), jnp.float32, -0.1, 0.1)

    return dict(wi=wi, bi=bi, wk=wk, bk=bk,
                w1i=w1i, w1k=w1k, b1=b1, s1=s1, t1=t1,
                w2=w2, b2=b2, s2=s2, t2=t2,
                w3=w3, b3=b3)


def fold_params(p, hw, *, weight_dtype=jnp.bfloat16):
    """Fold pool-scale, 0.95/0.05, encoder->fc1 collapse and eval-BN into
    weights; replicate wa over HW (flattened-pool trick); lane-pad fc3;
    store matmul weights in bf16 (biases stay f32)."""
    # encoder + fc1 collapse (valid only for the linear stand-in encoders)
    wa = (0.95 / hw) * (p["wi"] @ p["w1i"])                    # [Cin, E]
    wb = 0.05 * (p["wk"] @ p["w1k"])                           # [K,   E]
    c1 = 0.95 * (p["bi"] @ p["w1i"]) + 0.05 * (p["bk"] @ p["w1k"]) + p["b1"]
    # fold BN1
    wa = wa * p["s1"]
    wb = wb * p["s1"]
    c1 = c1 * p["s1"] + p["t1"]
    # fold BN2 into fc2
    w2 = p["w2"] * p["s2"]
    b2 = p["b2"] * p["s2"] + p["t2"]
    # lane-pad fc3 output to a multiple of 128 for unmasked stores
    E, C = p["w3"].shape
    Cp = max(128, _round_up(C, 128))
    w3 = jnp.pad(p["w3"], ((0, 0), (0, Cp - C)))
    b3 = jnp.pad(p["b3"], ((0, 0), (0, Cp - C)))
    # replicate wa over the HW spatial positions so the kernel does one
    # lane-dense K=Cin*HW matmul on the flattened x_i (1/HW already folded)
    wa_exp = jnp.repeat(wa, hw, axis=0)                        # [Cin*HW, E]
    return dict(wa=wa_exp.astype(weight_dtype),
                wb=wb.astype(weight_dtype),
                c1=c1.astype(jnp.float32),
                w2=w2.astype(weight_dtype),
                b2=b2.astype(jnp.float32),
                w3=w3.astype(weight_dtype),
                b3=b3.astype(jnp.float32))


# --------------------------------------------------------------------------
# Pure-JAX f32 reference (mirrors the PyTorch forward with stand-in encoders)
# --------------------------------------------------------------------------
def reference_forward(x_i, x_k, p):
    B, Cin, H, W = x_i.shape
    pooled = jnp.mean(x_i.reshape(B, Cin, H * W), axis=-1)
    xi_enc = (pooled @ p["wi"] + p["bi"]) * 0.95
    xk_enc = (x_k @ p["wk"] + p["bk"]) * 0.05
    x = jnp.concatenate([xi_enc, xk_enc], axis=1)
    w1 = jnp.concatenate([p["w1i"], p["w1k"]], axis=0)
    h = x @ w1 + p["b1"]
    h = jnp.maximum(h * p["s1"] + p["t1"], 0.0)
    h = jnp.maximum((h @ p["w2"] + p["b2"]) * p["s2"] + p["t2"], 0.0)
    return h @ p["w3"] + p["b3"]


if __name__ == "__main__":
    # Small shapes consistent with the module's forward (emb_size shrunk from
    # 512/2048 to 128 for a fast synthetic run).  B=16 <= block_b_target, so
    # the whole batch runs in a single grid step (grid=(1,)) as recommended.
    B, Cin, H, W = 16, 4, 16, 16
    num_keywords, emb_size, num_classes = 32, 128, 16

    key = jax.random.PRNGKey(0)
    k_img, k_kw, k_par = jax.random.split(key, 3)
    x_i = jax.random.normal(k_img, (B, Cin, H, W), jnp.float32)
    # multi-hot keyword vector
    x_k = (jax.random.uniform(k_kw, (B, num_keywords)) < 0.2).astype(jnp.float32)

    params = make_params(k_par, Cin, num_keywords, emb_size, num_classes)
    fused = fold_params(params, H * W)

    out = image_search_forward(x_i, x_k, fused, num_classes, block_b_target=256)
    out = jax.block_until_ready(out)

    ref = reference_forward(x_i, x_k, params)
    # bf16 storage of x_i / weights (f32 accumulation) -> loosened tolerance.
    np.testing.assert_allclose(np.asarray(out), np.asarray(ref),
                               rtol=1e-2, atol=1e-2)

    print("KERNEL_OK")
</pallas_src>

<mosaic_0001>
module attributes {stable_mosaic.version = 11 : i64} {
  func.func @image_search_kernel(%arg0: i32, %arg1: memref<16x1024xbf16, #tpu.memory_space<vmem>>, %arg2: memref<16x32xbf16, #tpu.memory_space<vmem>>, %arg3: memref<1024x128xbf16, #tpu.memory_space<vmem>>, %arg4: memref<32x128xbf16, #tpu.memory_space<vmem>>, %arg5: memref<1x128xf32, #tpu.memory_space<vmem>>, %arg6: memref<128x128xbf16, #tpu.memory_space<vmem>>, %arg7: memref<1x128xf32, #tpu.memory_space<vmem>>, %arg8: memref<128x128xbf16, #tpu.memory_space<vmem>>, %arg9: memref<1x128xf32, #tpu.memory_space<vmem>>, %arg10: memref<16x128xf32, #tpu.memory_space<vmem>>) attributes {dimension_semantics = [#tpu.dimension_semantics<parallel>], iteration_bounds = array<i64: 1>, scalar_prefetch = 0 : i64, scratch_operands = 0 : i64, tpu.core_type = #tpu.core_type<tc>, window_params = [{transform_indices = @transform_0, window_bounds = array<i64: 16, 1024>}, {transform_indices = @transform_1, window_bounds = array<i64: 16, 32>}, {pipeline_mode = #tpu.pipeline_mode<synchronous>, transform_indices = @transform_2, window_bounds = array<i64: 1024, 128>}, {pipeline_mode = #tpu.pipeline_mode<synchronous>, transform_indices = @transform_3, window_bounds = array<i64: 32, 128>}, {pipeline_mode = #tpu.pipeline_mode<synchronous>, transform_indices = @transform_4, window_bounds = array<i64: 1, 128>}, {pipeline_mode = #tpu.pipeline_mode<synchronous>, transform_indices = @transform_5, window_bounds = array<i64: 128, 128>}, {pipeline_mode = #tpu.pipeline_mode<synchronous>, transform_indices = @transform_6, window_bounds = array<i64: 1, 128>}, {pipeline_mode = #tpu.pipeline_mode<synchronous>, transform_indices = @transform_7, window_bounds = array<i64: 128, 128>}, {pipeline_mode = #tpu.pipeline_mode<synchronous>, transform_indices = @transform_8, window_bounds = array<i64: 1, 128>}, {transform_indices = @transform_9, window_bounds = array<i64: 16, 128>}]} {
    %c0 = arith.constant 0 : index
    %c0_0 = arith.constant 0 : index
    %0 = vector.load %arg1[%c0, %c0_0] : memref<16x1024xbf16, #tpu.memory_space<vmem>>, vector<16x1024xbf16>
    %c0_1 = arith.constant 0 : index
    %c0_2 = arith.constant 0 : index
    %1 = vector.load %arg3[%c0_1, %c0_2] : memref<1024x128xbf16, #tpu.memory_space<vmem>>, vector<1024x128xbf16>
    %cst = arith.constant dense<0.000000e+00> : vector<16x128xf32>
    %2 = tpu.matmul %0, %1, %cst {dimension_numbers = #tpu.dot_dimension_numbers<[1], [0], [0], [1], [0, 0, 1, 1], [], []>} : vector<16x1024xbf16>, vector<1024x128xbf16>, vector<16x128xf32> -> vector<16x128xf32>
    %c0_3 = arith.constant 0 : index
    %c0_4 = arith.constant 0 : index
    %3 = vector.load %arg2[%c0_3, %c0_4] : memref<16x32xbf16, #tpu.memory_space<vmem>>, vector<16x32xbf16>
    %c0_5 = arith.constant 0 : index
    %c0_6 = arith.constant 0 : index
    %4 = vector.load %arg4[%c0_5, %c0_6] : memref<32x128xbf16, #tpu.memory_space<vmem>>, vector<32x128xbf16>
    %cst_7 = arith.constant dense<0.000000e+00> : vector<16x128xf32>
    %5 = tpu.matmul %3, %4, %cst_7 {dimension_numbers = #tpu.dot_dimension_numbers<[1], [0], [0], [1], [0, 0, 1, 1], [], []>} : vector<16x32xbf16>, vector<32x128xbf16>, vector<16x128xf32> -> vector<16x128xf32>
    %6 = arith.addf %2, %5 : vector<16x128xf32>
    %c0_8 = arith.constant 0 : index
    %c0_9 = arith.constant 0 : index
    %7 = vector.load %arg5[%c0_8, %c0_9] : memref<1x128xf32, #tpu.memory_space<vmem>>, vector<1x128xf32>
    %8 = vector.broadcast %7 : vector<1x128xf32> to vector<16x128xf32>
    %9 = arith.addf %6, %8 : vector<16x128xf32>
    %cst_10 = arith.constant 0.000000e+00 : f32
    %10 = vector.broadcast %cst_10 : f32 to vector<16x128xf32>
    %11 = arith.maximumf %9, %10 : vector<16x128xf32>
    %12 = arith.truncf %11 : vector<16x128xf32> to vector<16x128xbf16>
    %c0_11 = arith.constant 0 : index
    %c0_12 = arith.constant 0 : index
    %13 = vector.load %arg6[%c0_11, %c0_12] : memref<128x128xbf16, #tpu.memory_space<vmem>>, vector<128x128xbf16>
    %cst_13 = arith.constant dense<0.000000e+00> : vector<16x128xf32>
    %14 = tpu.matmul %12, %13, %cst_13 {dimension_numbers = #tpu.dot_dimension_numbers<[1], [0], [0], [1], [0, 0, 1, 1], [], []>} : vector<16x128xbf16>, vector<128x128xbf16>, vector<16x128xf32> -> vector<16x128xf32>
    %c0_14 = arith.constant 0 : index
    %c0_15 = arith.constant 0 : index
    %15 = vector.load %arg7[%c0_14, %c0_15] : memref<1x128xf32, #tpu.memory_space<vmem>>, vector<1x128xf32>
    %16 = vector.broadcast %15 : vector<1x128xf32> to vector<16x128xf32>
    %17 = arith.addf %14, %16 : vector<16x128xf32>
    %cst_16 = arith.constant 0.000000e+00 : f32
    %18 = vector.broadcast %cst_16 : f32 to vector<16x128xf32>
    %19 = arith.maximumf %17, %18 : vector<16x128xf32>
    %20 = arith.truncf %19 : vector<16x128xf32> to vector<16x128xbf16>
    %c0_17 = arith.constant 0 : index
    %c0_18 = arith.constant 0 : index
    %21 = vector.load %arg8[%c0_17, %c0_18] : memref<128x128xbf16, #tpu.memory_space<vmem>>, vector<128x128xbf16>
    %cst_19 = arith.constant dense<0.000000e+00> : vector<16x128xf32>
    %22 = tpu.matmul %20, %21, %cst_19 {dimension_numbers = #tpu.dot_dimension_numbers<[1], [0], [0], [1], [0, 0, 1, 1], [], []>} : vector<16x128xbf16>, vector<128x128xbf16>, vector<16x128xf32> -> vector<16x128xf32>
    %c0_20 = arith.constant 0 : index
    %c0_21 = arith.constant 0 : index
    %23 = vector.load %arg9[%c0_20, %c0_21] : memref<1x128xf32, #tpu.memory_space<vmem>>, vector<1x128xf32>
    %24 = vector.broadcast %23 : vector<1x128xf32> to vector<16x128xf32>
    %25 = arith.addf %22, %24 : vector<16x128xf32>
    %c0_22 = arith.constant 0 : index
    %c0_23 = arith.constant 0 : index
    %26 = vector.load %arg10[%c0_22, %c0_23] : memref<16x128xf32, #tpu.memory_space<vmem>>, vector<16x128xf32>
    tpu.vector_store %arg10[%c0_22, %c0_23], %25 {strides = array<i32>} : memref<16x128xf32, #tpu.memory_space<vmem>>, vector<16x128xf32>,
    return
  }
  func.func @transform_0(%arg0: i32) -> (i32, i32) {
    %c0_i32 = arith.constant 0 : i32
    %c0_i32_0 = arith.constant 0 : i32
    return %arg0, %c0_i32 : i32, i32
  }
  func.func @transform_1(%arg0: i32) -> (i32, i32) {
    %c0_i32 = arith.constant 0 : i32
    %c0_i32_0 = arith.constant 0 : i32
    return %arg0, %c0_i32 : i32, i32
  }
  func.func @transform_2(%arg0: i32) -> (i32, i32) {
    %c0_i32 = arith.constant 0 : i32
    %c0_i32_0 = arith.constant 0 : i32
    %c0_i32_1 = arith.constant 0 : i32
    return %c0_i32, %c0_i32_0 : i32, i32
  }
  func.func @transform_3(%arg0: i32) -> (i32, i32) {
    %c0_i32 = arith.constant 0 : i32
    %c0_i32_0 = arith.constant 0 : i32
    %c0_i32_1 = arith.constant 0 : i32
    return %c0_i32, %c0_i32_0 : i32, i32
  }
  func.func @transform_4(%arg0: i32) -> (i32, i32) {
    %c0_i32 = arith.constant 0 : i32
    %c0_i32_0 = arith.constant 0 : i32
    %c0_i32_1 = arith.constant 0 : i32
    return %c0_i32, %c0_i32_0 : i32, i32
  }
  func.func @transform_5(%arg0: i32) -> (i32, i32) {
    %c0_i32 = arith.constant 0 : i32
    %c0_i32_0 = arith.constant 0 : i32
    %c0_i32_1 = arith.constant 0 : i32
    return %c0_i32, %c0_i32_0 : i32, i32
  }
  func.func @transform_6(%arg0: i32) -> (i32, i32) {
    %c0_i32 = arith.constant 0 : i32
    %c0_i32_0 = arith.constant 0 : i32
    %c0_i32_1 = arith.constant 0 : i32
    return %c0_i32, %c0_i32_0 : i32, i32
  }
  func.func @transform_7(%arg0: i32) -> (i32, i32) {
    %c0_i32 = arith.constant 0 : i32
    %c0_i32_0 = arith.constant 0 : i32
    %c0_i32_1 = arith.constant 0 : i32
    return %c0_i32, %c0_i32_0 : i32, i32
  }
  func.func @transform_8(%arg0: i32) -> (i32, i32) {
    %c0_i32 = arith.constant 0 : i32
    %c0_i32_0 = arith.constant 0 : i32
    %c0_i32_1 = arith.constant 0 : i32
    return %c0_i32, %c0_i32_0 : i32, i32
  }
  func.func @transform_9(%arg0: i32) -> (i32, i32) {
    %c0_i32 = arith.constant 0 : i32
    %c0_i32_0 = arith.constant 0 : i32
    return %arg0, %c0_i32 : i32, i32
  }
}

</mosaic_0001>

<bundles_post_ra>
// kernel: tpu_custom_call.1
= control target key start
LH: loop header
LB: loop body
LE: loop exit
PB: predicated region body
PF: predicated region fallthrough
CT: control target
= control target key end

     0   :  { %14 = vsyncpa [#allocation3], 0  ;;  %s1880_s0 = inlined_call_operand.hbm [shape: bf16[16,1024], index: 0, kind: input, shape index: {}]   ;;  %s1881_s1 = inlined_call_operand.hbm [shape: bf16[16,32], index: 1, kind: input, shape index: {}]   ;;  %s1882_s2 = inlined_call_operand.hbm [shape: bf16[1024,128], index: 2, kind: input, shape index: {}]   ;;  %s1883_s3 = inlined_call_operand.hbm [shape: bf16[32,128], index: 3, kind: input, shape index: {}]   ;;  %s1884_s4 = inlined_call_operand.vmem [shape: f32[1,128], index: 4, kind: input, shape index: {}]   ;;  %s1885_s5 = inlined_call_operand.hbm [shape: bf16[128,128], index: 5, kind: input, shape index: {}]   ;;  %s1886_s6 = inlined_call_operand.vmem [shape: f32[1,128], index: 6, kind: input, shape index: {}]   ;;  %s1887_s7 = inlined_call_operand.hbm [shape: bf16[128,128], index: 7, kind: input, shape index: {}]   ;;  %s1888_s8 = inlined_call_operand.vmem [shape: f32[1,128], index: 8, kind: input, shape index: {}]   ;;  %s1889_s9 = inlined_call_operand.hbm [shape: f32[16,128], index: 9, kind: output, shape index: {}]  }
   0x1   :  { %15 = vsyncpa [#allocation6], 0 }
   0x2   :  { %16 = vsyncpa [#allocation9], 0 }
   0x3   :  { %17 = vsyncpa [#allocation12], 0 }
   0x4   :  { %18 = vsyncpa [#allocation4], 0  ;;  %s1683_s30 = smov [#allocation5]   ;;  %s1519_s13 = scalar_lea.hbm %s1881_s1, 128 }
   0x5   :  { %s36_s10 = sshll.u32 %s1683_s30, 4  ;;  %p1520_p0 = scmp.ne.s32.totalorder %s1881_s1, %s1519_s13  ;;  %s37_s10 = int_to_ptr.vmem [resolvable:$true] %s36_s10 }
   0x6   :  { %p1523_p1 = scmp.lt.u32.totalorder %s1519_s13, %s1881_s1 }
   0x8   :  { %p1525_p2 = pnand %p1523_p1, %p1520_p0 }
   0xa   :  { %1528 = shalt.err (!%p1525_p2)
}
   0xb   :  { %s1529_s18 = scalar_lea.vmem %s37_s10, 128  ;;  %p1534_p4 = scmp.lt.s32.totalorder %s37_s10, %s37_s10 }
   0xc   :  { %p1530_p3 = scmp.ne.s32.totalorder %s37_s10, %s1529_s18  ;;  %p1535_p5 = scmp.lt.s32.totalorder %s1529_s18, %s1529_s18 }
   0xe   :  { %p1536_p6 = por %p1535_p5, %p1534_p4 }
  0x10   :  { %p1537_p7 = pnand %p1536_p6, %p1530_p3 }
  0x12   :  { %1540 = shalt.err (!%p1537_p7)
}
  0x13   :  { %s1684_s19 = smov 64   ;;  %s1685_s20 = smov 4  }
  0x14   :  { %42 = dma.hbm_to_vmem [thread:$0]  %s1881_s1, 128, %s37_s10, [#allocation6], %s1684_s19, %s1684_s19, %s1685_s20  }
  0x15   :  { %s1686_s23 = smov [#allocation8]   ;;  %s1687_s25 = smov [#allocation2]  }
  0x16   :  { %s60_s24 = sshll.u32 %s1686_s23, 4  ;;  %s24_s26 = sshll.u32 %s1687_s25, 4  ;;  %s61_s24 = int_to_ptr.vmem [resolvable:$true] %s60_s24  ;;  %s25_s26 = int_to_ptr.vmem [resolvable:$true] %s24_s26 }
  0x17   :  { %s1541_s29 = scalar_lea.hbm %s1883_s3, 256 }
  0x18   :  { %p1542_p8 = scmp.ne.s32.totalorder %s1883_s3, %s1541_s29  ;;  %p1545_p9 = scmp.lt.u32.totalorder %s1541_s29, %s1883_s3 }
  0x1a   :  { %p1547_p10 = pnand %p1545_p9, %p1542_p8 }
  0x1c   :  { %1550 = shalt.err (!%p1547_p10)
}
  0x1d   :  { %s1551_s1 = scalar_lea.vmem %s61_s24, 256  ;;  %p1556_p12 = scmp.lt.s32.totalorder %s61_s24, %s61_s24 }
  0x1e   :  { %p1552_p11 = scmp.ne.s32.totalorder %s61_s24, %s1551_s1  ;;  %p1557_p13 = scmp.lt.s32.totalorder %s1551_s1, %s1551_s1 }
  0x20   :  { %p1558_p0 = por %p1557_p13, %p1556_p12 }
  0x22   :  { %p1559_p1 = pnand %p1558_p0, %p1552_p11 }
  0x24   :  { %1562 = shalt.err (!%p1559_p1)
}
  0x25   :  { %66 = dma.hbm_to_vmem [thread:$0]  %s1883_s3, 256, %s61_s24, [#allocation9], %s1684_s19, %s1684_s19, %s1685_s20  }
  0x26   :  { %s1563_s17 = scalar_lea.hbm %s1880_s0, 1024 }
  0x27   :  { %p1564_p2 = scmp.ne.s32.totalorder %s1880_s0, %s1563_s17  ;;  %p1567_p3 = scmp.lt.u32.totalorder %s1563_s17, %s1880_s0 }
  0x29   :  { %p1569_p4 = pnand %p1567_p3, %p1564_p2 }
  0x2b   :  { %1572 = shalt.err (!%p1569_p4)
}
  0x2c   :  { %s1573_s25 = scalar_lea.vmem %s25_s26, 1024  ;;  %p1578_p6 = scmp.lt.s32.totalorder %s25_s26, %s25_s26 }
  0x2d   :  { %p1574_p5 = scmp.ne.s32.totalorder %s25_s26, %s1573_s25  ;;  %p1579_p7 = scmp.lt.s32.totalorder %s1573_s25, %s1573_s25 }
  0x2f   :  { %p1580_p8 = por %p1579_p7, %p1578_p6 }
  0x31   :  { %p1581_p9 = pnand %p1580_p8, %p1574_p5 }
  0x33   :  { %1584 = shalt.err (!%p1581_p9)
}
  0x34   :  { %s1688_s3 = smov 512   ;;  %s1689_s24 = smov 32  }
  0x35   :  { %30 = dma.hbm_to_vmem [thread:$0]  %s1880_s0, 1024, %s25_s26, [#allocation3], %s1688_s3, %s1688_s3, %s1689_s24  }
  0x36   :  { %s1690_s29 = smov [#allocation7]   ;;  %s1691_s11 = smov [#allocation10]  }
  0x37   :  { %s48_s30 = sshll.u32 %s1690_s29, 4  ;;  %s74_s12 = sshll.u32 %s1691_s11, 4  ;;  %s49_s30 = int_to_ptr.vmem [resolvable:$true] %s48_s30  ;;  %s75_s12 = int_to_ptr.vmem [resolvable:$true] %s74_s12 }
  0x38   :  { %s1585_s10 = scalar_lea.hbm %s1882_s2, 8192 }
  0x39   :  { %p1586_p10 = scmp.ne.s32.totalorder %s1882_s2, %s1585_s10  ;;  %p1589_p11 = scmp.lt.u32.totalorder %s1585_s10, %s1882_s2 }
  0x3b   :  { %p1591_p12 = pnand %p1589_p11, %p1586_p10 }
  0x3d   :  { %1594 = shalt.err (!%p1591_p12)
}
  0x3e   :  { %s1595_s0 = scalar_lea.vmem %s49_s30, 8192  ;;  %p1600_p0 = scmp.lt.s32.totalorder %s49_s30, %s49_s30 }
  0x3f   :  { %p1596_p13 = scmp.ne.s32.totalorder %s49_s30, %s1595_s0  ;;  %p1601_p1 = scmp.lt.s32.totalorder %s1595_s0, %s1595_s0 }
  0x41   :  { %p1602_p2 = por %p1601_p1, %p1600_p0 }
  0x43   :  { %p1603_p3 = pnand %p1602_p2, %p1596_p13 }
  0x45   :  { %1606 = shalt.err (!%p1603_p3)
}
  0x46   :  { %54 = dma.hbm_to_vmem [thread:$0]  %s1882_s2, 8192, %s49_s30, [#allocation6], %s1684_s19, %s1684_s19, %s1685_s20  }
  0x47   :  { %s1607_s23 = scalar_lea.hbm %s1885_s5, 1024 }
  0x48   :  { %p1608_p4 = scmp.ne.s32.totalorder %s1885_s5, %s1607_s23  ;;  %p1611_p5 = scmp.lt.u32.totalorder %s1607_s23, %s1885_s5 }
  0x4a   :  { %p1613_p6 = pnand %p1611_p5, %p1608_p4 }
  0x4c   :  { %1616 = shalt.err (!%p1613_p6)
}
  0x4d   :  { %s1617_s28 = scalar_lea.vmem %s75_s12, 1024  ;;  %p1622_p8 = scmp.lt.s32.totalorder %s75_s12, %s75_s12 }
  0x4e   :  { %p1618_p7 = scmp.ne.s32.totalorder %s75_s12, %s1617_s28  ;;  %p1623_p9 = scmp.lt.s32.totalorder %s1617_s28, %s1617_s28 }
  0x50   :  { %p1624_p10 = por %p1623_p9, %p1622_p8 }
  0x52   :  { %p1625_p11 = pnand %p1624_p10, %p1618_p7 }
  0x54   :  { %1628 = shalt.err (!%p1625_p11)
}
  0x55   :  { %80 = dma.hbm_to_vmem [thread:$0]  %s1885_s5, 1024, %s75_s12, [#allocation9], %s1684_s19, %s1684_s19, %s1685_s20  }
  0x56   :  { %s1692_s30 = smov [#allocation11]   ;;  %s1629_s10 = scalar_lea.hbm %s1887_s7, 1024 }
  0x57   :  { %s88_s11 = sshll.u32 %s1692_s30, 4  ;;  %p1630_p12 = scmp.ne.s32.totalorder %s1887_s7, %s1629_s10  ;;  %s89_s11 = int_to_ptr.vmem [resolvable:$true] %s88_s11 }
  0x58   :  { %p1633_p13 = scmp.lt.u32.totalorder %s1629_s10, %s1887_s7 }
  0x5a   :  { %p1635_p0 = pnand %p1633_p13, %p1630_p12 }
  0x5c   :  { %1638 = shalt.err (!%p1635_p0)
}
  0x5d   :  { %s1639_s0 = scalar_lea.vmem %s89_s11, 1024  ;;  %p1644_p2 = scmp.lt.s32.totalorder %s89_s11, %s89_s11 }
  0x5e   :  { %p1640_p1 = scmp.ne.s32.totalorder %s89_s11, %s1639_s0  ;;  %p1645_p3 = scmp.lt.s32.totalorder %s1639_s0, %s1639_s0 }
  0x60   :  { %p1646_p4 = por %p1645_p3, %p1644_p2 }
  0x62   :  { %p1647_p5 = pnand %p1646_p4, %p1640_p1 }
  0x64   :  { %1650 = shalt.err (!%p1647_p5)
}
  0x65   :  { %94 = dma.hbm_to_vmem [thread:$0]  %s1887_s7, 1024, %s89_s11, [#allocation12], %s1684_s19, %s1684_s19, %s1685_s20  }
  0x66   :  { %1673 = dma.done.wait [#allocation3], 1024  }
  0x67   :  { %1674 = vsyncadd [#allocation3], 4294966272 }
  0x68   :  { %1675 = dma.done.wait [#allocation6], 8320  }
  0x69   :  { %1676 = vsyncadd [#allocation6], 4294958976 }
  0x6a   :  { %1677 = dma.done.wait [#allocation9], 1280  }
  0x6b   :  { %1678 = vsyncadd [#allocation9], 4294966016 }
  0x6c   :  { %1679 = dma.done.wait [#allocation12], 1024  }
  0x6d   :  { %1680 = vsyncadd [#allocation12], 4294966272  ;;  %v1693_v0 = vmov 0.0   ;;  %vm1694_vm0 = vmmov 0   ;;  %v1436_v1 = vld [vmem:[#allocation8] sm:$0xff]   ;;  %v1439_v4 = vld [vmem:[#allocation8 + $0x8] sm:$0xff]  }
  0x6e   :  { %1373 = vmatprep.subr.bf16.mxu0 %v1693_v0  ;;  %1377 = vmatprep.mubr.msk.bf16.mxu0 %vm1694_vm0, %v1693_v0  ;;  %v1437_v2 = vld [vmem:[#allocation7 + $0x40] sm:$0xff]   ;;  %v1440_v5 = vld [vmem:[#allocation7 + $0x48] sm:$0xff]   ;;  %v1442_v7 = vld [vmem:[#allocation5] sm:$0xff]   ;;  %vm275_vm1 = vcmask 261120   ;;  %s1695_s21 = smov [#allocation13]  }
  0x6f   :  { %1374 = vmatpush3.bf16.msra.mxu0 %v1436_v1  ;;  %v1438_v3 = vld [vmem:[#allocation7] sm:$0xff]   ;;  %1267 = vmatprep.subr.bf16.mxu1 %v1437_v2  ;;  %v1441_v6 = vld [vmem:[#allocation7 + $0x8] sm:$0xff]   ;;  %v1444_v9 = vld [vmem:[#allocation7 + $0x50] sm:$0xff]   ;;  %s1154_s22 = sshll.u32 %s1695_s21, 4  ;;  %s1155_s22 = int_to_ptr.vmem [resolvable:$true] %s1154_s22 }
  0x70   :  { %1375 = vmatprep.subr.bf16.mxu0 %v1693_v0  ;;  %1268 = vmatpush3.bf16.msra.mxu1 %v1438_v3  ;;  %v1443_v8 = vld [vmem:[#allocation7 + $0xc0] sm:$0xff]   ;;  %v1446_v11 = vld [vmem:[#allocation7 + $0x10] sm:$0xff]   ;;  %v1447_v12 = vld [vmem:[#allocation7 + $0xc8] sm:$0xff]   ;;  %p1656_p7 = scmp.lt.s32.totalorder %s1155_s22, %s1155_s22 }
  0x71   :  { %1269 = vmatprep.subr.bf16.mxu1 %v1440_v5  ;;  %v1445_v10 = vld [vmem:[#allocation7 + $0x80] sm:$0xff]   ;;  %v1448_v13 = vld [vmem:[#allocation7 + $0x58] sm:$0xff]   ;;  %v1449_v14 = vld [vmem:[#allocation7 + $0x88] sm:$0xff]  }
  0x72   :  { %v1450_v15 = vld [vmem:[#allocation7 + $0x18] sm:$0xff]   ;;  %v1451_v16 = vld [vmem:[#allocation7 + $0xd0] sm:$0xff]   ;;  %v1452_v17 = vld [vmem:[#allocation7 + $0x60] sm:$0xff]  }
  0x73   :  { %1376 = vmatpush3.bf16.msra.mxu0 %v1439_v4  ;;  %v1453_v18 = vld [vmem:[#allocation7 + $0x90] sm:$0xff]   ;;  %v1454_v19 = vld [vmem:[#allocation7 + $0x20] sm:$0xff]   ;;  %v1455_v20 = vld [vmem:[#allocation7 + $0xd8] sm:$0xff]  }
  0x74   :  { %1270 = vmatpush3.bf16.msra.mxu1 %v1441_v6  ;;  %1289 = vmatprep.subr.bf16.mxu0 %v1443_v8  ;;  %v1456_v21 = vld [vmem:[#allocation7 + $0x68] sm:$0xff]   ;;  %v1457_v22 = vld [vmem:[#allocation7 + $0x98] sm:$0xff]   ;;  %v1459_v24 = vld [vmem:[#allocation7 + $0xe0] sm:$0xff]  }
  0x75   :  { %1271 = vmatprep.subr.bf16.mxu1 %v1444_v9  ;;  %v1458_v23 = vld [vmem:[#allocation7 + $0x28] sm:$0xff]   ;;  %v1460_v25 = vld [vmem:[#allocation7 + $0x70] sm:$0xff]   ;;  %v1461_v26 = vld [vmem:[#allocation7 + $0xa0] sm:$0xff]  }
  0x76   :  { %1378 = vmatmul.mubr.msk.bf16.vlgmr.msra.gmra.mrb[0].mxu0 %vm275_vm1, %v1442_v7  ;;  %v1462_v27 = vld [vmem:[#allocation7 + $0x30] sm:$0xff]   ;;  %v1463_v28 = vld [vmem:[#allocation7 + $0xe8] sm:$0xff]   ;;  %v1464_v29 = vld [vmem:[#allocation7 + $0x78] sm:$0xff]  }
  0x77   :  { %1290 = vmatpush3.bf16.msra.mxu0 %v1445_v10  ;;  %v1465_v30 = vld [vmem:[#allocation7 + $0xa8] sm:$0xff]   ;;  %v1466_v31 = vld [vmem:[#allocation7 + $0x38] sm:$0xff]   ;;  %v1467_v36 = vld [vmem:[#allocation7 + $0xf0] sm:$0xff]  }
  0x78   :  { %1272 = vmatpush3.bf16.msra.mxu1 %v1446_v11  ;;  %1291 = vmatprep.subr.bf16.mxu0 %v1447_v12  ;;  %v116_v32 = vld [vmem:[#allocation2] sm:$0xff]  ;;  %v1468_v37 = vld [vmem:[#allocation7 + $0xb0] sm:$0xff]   ;;  %v1469_v38 = vld [vmem:[#allocation7 + $0x140] sm:$0xff]  }
  0x79   :  { %1273 = vmatprep.subr.bf16.mxu1 %v1448_v13  ;;  %v120_v33 = vld [vmem:[#allocation2 + $0x20] sm:$0xff]  ;;  %v1470_v39 = vld [vmem:[#allocation7 + $0x100] sm:$0xff]   ;;  %v1473_v42 = vld [vmem:[#allocation7 + $0x148] sm:$0xff]  }
  0x7a   :  { %v1173_v34 = vcombine.low %v116_v32, %v120_v33  ;;  %v1174_v35 = vcombine.high %v116_v32, %v120_v33  ;;  %v1471_v40 = vld [vmem:[#allocation7 + $0xf8] sm:$0xff]   ;;  %v1474_v43 = vld [vmem:[#allocation7 + $0x108] sm:$0xff]   ;;  %v117_v44 = vld [vmem:[#allocation2 + $0x8] sm:$0xff] }
  0x7b   :  { %1292 = vmatpush3.bf16.msra.mxu0 %v1449_v14  ;;  %v1472_v41 = vld [vmem:[#allocation7 + $0xb8] sm:$0xff]   ;;  %v121_v45 = vld [vmem:[#allocation2 + $0x28] sm:$0xff]  ;;  %v1476_v49 = vld [vmem:[#allocation7 + $0x150] sm:$0xff]  }
  0x7c   :  { %1274 = vmatpush3.bf16.msra.mxu1 %v1450_v15  ;;  %1293 = vmatprep.subr.bf16.mxu0 %v1451_v16  ;;  %v1175_v46 = vcombine.low %v117_v44, %v121_v45  ;;  %v1176_v47 = vcombine.high %v117_v44, %v121_v45  ;;  %v1475_v48 = vld [vmem:[#allocation7 + $0x1c0] sm:$0xff]   ;;  %v1478_v51 = vld [vmem:[#allocation7 + $0x110] sm:$0xff]   ;;  %v1479_v52 = vld [vmem:[#allocation7 + $0x1c8] sm:$0xff]  }
  0x7d   :  { %1275 = vmatprep.subr.bf16.mxu1 %v1452_v17  ;;  %776 = vmatprep.mubr.bf16.mxu1 %v1174_v35  ;;  %v1477_v50 = vld [vmem:[#allocation7 + $0x180] sm:$0xff]   ;;  %v1480_v53 = vld [vmem:[#allocation7 + $0x158] sm:$0xff]   ;;  %v1481_v54 = vld [vmem:[#allocation7 + $0x188] sm:$0xff]  }
  0x7e   :  { %817 = vmatprep.mubr.bf16.mxu0 %v1176_v47  ;;  %v1482_v55 = vld [vmem:[#allocation7 + $0x118] sm:$0xff]   ;;  %v1483_v56 = vld [vmem:[#allocation7 + $0x1d0] sm:$0xff]   ;;  %v1484_v57 = vld [vmem:[#allocation7 + $0x160] sm:$0xff]  }
  0x7f   :  { %1294 = vmatpush3.bf16.msra.mxu0 %v1453_v18  ;;  %v1485_v58 = vld [vmem:[#allocation7 + $0x190] sm:$0xff]   ;;  %v1486_v59 = vld [vmem:[#allocation7 + $0x120] sm:$0xff]   ;;  %v1487_v60 = vld [vmem:[#allocation7 + $0x1d8] sm:$0xff]  }
  0x80   :  { %1276 = vmatpush3.bf16.msra.mxu1 %v1454_v19  ;;  %1295 = vmatprep.subr.bf16.mxu0 %v1455_v20  ;;  %v1488_v61 = vld [vmem:[#allocation7 + $0x168] sm:$0xff]   ;;  %v1489_v62 = vld [vmem:[#allocation7 + $0x198] sm:$0xff]   ;;  %v1491_v1 = vld [vmem:[#allocation7 + $0x1e0] sm:$0xff]  }
  0x81   :  { %1277 = vmatprep.subr.bf16.mxu1 %v1456_v21  ;;  %v1490_v63 = vld [vmem:[#allocation7 + $0x128] sm:$0xff]   ;;  %v1492_v2 = vld [vmem:[#allocation7 + $0x170] sm:$0xff]   ;;  %v1493_v3 = vld [vmem:[#allocation7 + $0x1a0] sm:$0xff]  }
  0x82   :  { %v1494_v4 = vld [vmem:[#allocation7 + $0x130] sm:$0xff]   ;;  %v1495_v5 = vld [vmem:[#allocation7 + $0x1e8] sm:$0xff]   ;;  %v1496_v6 = vld [vmem:[#allocation7 + $0x178] sm:$0xff]  }
  0x83   :  { %1296 = vmatpush3.bf16.msra.mxu0 %v1457_v22  ;;  %v1497_v7 = vld [vmem:[#allocation7 + $0x1a8] sm:$0xff]   ;;  %v1498_v8 = vld [vmem:[#allocation7 + $0x138] sm:$0xff]   ;;  %v1499_v13 = vld [vmem:[#allocation7 + $0x1f0] sm:$0xff]  }
  0x84   :  { %1278 = vmatpush3.bf16.msra.mxu1 %v1458_v23  ;;  %1297 = vmatprep.subr.bf16.mxu0 %v1459_v24  ;;  %v118_v9 = vld [vmem:[#allocation2 + $0x10] sm:$0xff]  ;;  %v1500_v14 = vld [vmem:[#allocation7 + $0x1b0] sm:$0xff]   ;;  %v1501_v15 = vld [vmem:[#allocation7 + $0x1f8] sm:$0xff]  }
  0x85   :  { %1279 = vmatprep.subr.bf16.mxu1 %v1460_v25  ;;  %v122_v10 = vld [vmem:[#allocation2 + $0x30] sm:$0xff]  ;;  %v1502_v16 = vld [vmem:[#allocation7 + $0x1b8] sm:$0xff]   ;;  %v119_v17 = vld [vmem:[#allocation2 + $0x18] sm:$0xff] }
  0x86   :  { %v1177_v11 = vcombine.low %v118_v9, %v122_v10  ;;  %v1178_v12 = vcombine.high %v118_v9, %v122_v10  ;;  %v123_v18 = vld [vmem:[#allocation2 + $0x38] sm:$0xff]  ;;  %v1504_v22 = vld [vmem:[#allocation10 + $0x8] sm:$0xff]   ;;  %v1505_v23 = vld [vmem:[#allocation10 + $0x10] sm:$0xff]  }
  0x87   :  { %1298 = vmatpush3.bf16.msra.mxu0 %v1461_v26  ;;  %v1180_v19 = vcombine.high %v119_v17, %v123_v18  ;;  %v1179_v20 = vcombine.low %v119_v17, %v123_v18  ;;  %v1503_v21 = vld [vmem:[#allocation10] sm:$0xff]   ;;  %v1506_v24 = vld [vmem:[#allocation10 + $0x18] sm:$0xff]   ;;  %v1508_v26 = vld [vmem:[#allocation10 + $0x28] sm:$0xff]  }
  0x88   :  { %1280 = vmatpush3.bf16.msra.mxu1 %v1462_v27  ;;  %1299 = vmatprep.subr.bf16.mxu0 %v1463_v28  ;;  %v1507_v25 = vld [vmem:[#allocation10 + $0x20] sm:$0xff]   ;;  %v1509_v27 = vld [vmem:[#allocation10 + $0x30] sm:$0xff]   ;;  %v1510_v28 = vld [vmem:[#allocation10 + $0x38] sm:$0xff]  }
  0x89   :  { %1281 = vmatprep.subr.bf16.mxu1 %v1464_v29  ;;  %v1511_v29 = vld [vmem:[#allocation11] sm:$0xff]   ;;  %v1514_v32 = vld [vmem:[#allocation11 + $0x18] sm:$0xff]  }
  0x8a   :  { %v1515_v33 = vld [vmem:[#allocation11 + $0x20] sm:$0xff]  }
  0x8b   :  { %1300 = vmatpush3.bf16.msra.mxu0 %v1465_v30  ;;  %v1512_v30 = vld [vmem:[#allocation11 + $0x8] sm:$0xff]  }
  0x8c   :  { %1282 = vmatpush3.bf16.msra.mxu1 %v1466_v31  ;;  %1301 = vmatprep.subr.bf16.mxu0 %v1467_v36  ;;  %v1513_v31 = vld [vmem:[#allocation11 + $0x10] sm:$0xff]  }
  0x8d   :  { %1311 = vmatprep.subr.bf16.mxu1 %v1469_v38 }
  0x8f   :  { %777 = vmatmul.mubr.bf16.vlgmr.msra.gmra.mrb[0].mxu1 %v1173_v34  ;;  %1302 = vmatpush3.bf16.msra.mxu0 %v1468_v37  ;;  %v1516_v34 = vld [vmem:[#allocation11 + $0x28] sm:$0xff]  }
  0x90   :  { %1312 = vmatpush3.bf16.msra.mxu1 %v1470_v39  ;;  %1303 = vmatprep.subr.bf16.mxu0 %v1471_v40 }
  0x91   :  { %1313 = vmatprep.subr.bf16.mxu1 %v1473_v42  ;;  %858 = vmatprep.mubr.bf16.mxu1 %v1178_v12 }
  0x93   :  { %1304 = vmatpush3.bf16.msra.mxu0 %v1472_v41 }
  0x94   :  { %1314 = vmatpush3.bf16.msra.mxu1 %v1474_v43  ;;  %1333 = vmatprep.subr.bf16.mxu0 %v1475_v48 }
  0x95   :  { %1315 = vmatprep.subr.bf16.mxu1 %v1476_v49 }
  0x96   :  { %818 = vmatmul.mubr.bf16.vlgmr.msra.gmra.mrb[4].mxu0 %v1175_v46 }
  0x97   :  { %1334 = vmatpush3.bf16.msra.mxu0 %v1477_v50  ;;  %899 = vmatprep.mubr.bf16.mxu0 %v1180_v19 }
  0x98   :  { %1316 = vmatpush3.bf16.msra.mxu1 %v1478_v51  ;;  %1335 = vmatprep.subr.bf16.mxu0 %v1479_v52 }
  0x99   :  { %1317 = vmatprep.subr.bf16.mxu1 %v1480_v53 }
  0x9b   :  { %1336 = vmatpush3.bf16.msra.mxu0 %v1481_v54 }
  0x9c   :  { %1318 = vmatpush3.bf16.msra.mxu1 %v1482_v55  ;;  %1337 = vmatprep.subr.bf16.mxu0 %v1483_v56 }
  0x9d   :  { %1319 = vmatprep.subr.bf16.mxu1 %v1484_v57 }
  0x9f   :  { %1338 = vmatpush3.bf16.msra.mxu0 %v1485_v58 }
  0xa0   :  { %1320 = vmatpush3.bf16.msra.mxu1 %v1486_v59  ;;  %1339 = vmatprep.subr.bf16.mxu0 %v1487_v60 }
  0xa1   :  { %1321 = vmatprep.subr.bf16.mxu1 %v1488_v61 }
  0xa3   :  { %1340 = vmatpush3.bf16.msra.mxu0 %v1489_v62 }
  0xa4   :  { %1322 = vmatpush3.bf16.msra.mxu1 %v1490_v63  ;;  %1341 = vmatprep.subr.bf16.mxu0 %v1491_v1 }
  0xa5   :  { %1323 = vmatprep.subr.bf16.mxu1 %v1492_v2 }
  0xa7   :  { %1342 = vmatpush3.bf16.msra.mxu0 %v1493_v3 }
  0xa8   :  { %1324 = vmatpush3.bf16.msra.mxu1 %v1494_v4  ;;  %1343 = vmatprep.subr.bf16.mxu0 %v1495_v5  ;;  %v1245_v4 = vld [vmem:[%s1884_s4] ss:$0 sm:$0xff] }
  0xa9   :  { %1325 = vmatprep.subr.bf16.mxu1 %v1496_v6 }
  0xab   :  { %1344 = vmatpush3.bf16.msra.mxu0 %v1497_v7 }
  0xac   :  { %1326 = vmatpush3.bf16.msra.mxu1 %v1498_v8  ;;  %1345 = vmatprep.subr.bf16.mxu0 %v1499_v13 }
  0xad   :  { %1381 = vmatprep.subr.bf16.mxu1 %v1693_v0 }
  0xaf   :  { %859 = vmatmul.mubr.bf16.vlgmr.msra.gmra.mrb[4].mxu1 %v1177_v11  ;;  %1346 = vmatpush3.bf16.msra.mxu0 %v1500_v14  ;;  %v1517_v14 = vld [vmem:[#allocation11 + $0x30] sm:$0xff]  }
  0xb0   :  { %1347 = vmatprep.subr.bf16.mxu0 %v1501_v15  ;;  %1397 = vmatprep.mubr.msk.bf16.mxu1 %vm1694_vm0, %v1693_v0  ;;  %v1518_v15 = vld [vmem:[#allocation11 + $0x38] sm:$0xff]  }
  0xb1   :  { %1382 = vmatpush3.bf16.msra.mxu1 %v1503_v21 }
  0xb2   :  { %1383 = vmatprep.subr.bf16.mxu1 %v1693_v0 }
  0xb3   :  { %1348 = vmatpush3.bf16.msra.mxu0 %v1502_v16  ;;  %v1246_v16 = vld [vmem:[%s1886_s6] ss:$0 sm:$0xff]  ;;  %s1651_s6 = scalar_lea.vmem %s1155_s22, 256 }
  0xb4   :  { %1401 = vmatprep.subr.bf16.mxu0 %v1693_v0  ;;  %p1652_p6 = scmp.ne.s32.totalorder %s1155_s22, %s1651_s6  ;;  %p1657_p8 = scmp.lt.s32.totalorder %s1651_s6, %s1651_s6 }
  0xb5   :  { %1384 = vmatpush3.bf16.msra.mxu1 %v1504_v22 }
  0xb6   :  { %900 = vmatmul.mubr.bf16.vlgmr.msra.gmra.mrb[8].mxu0 %v1179_v20  ;;  %1385 = vmatprep.subr.bf16.mxu1 %v1693_v0  ;;  %p1658_p9 = por %p1657_p8, %p1656_p7 }
  0xb7   :  { %1417 = vmatprep.mubr.msk.bf16.mxu0 %vm1694_vm0, %v1693_v0  ;;  %1402 = vmatpush3.bf16.msra.mxu0 %v1511_v29 }
  0xb8   :  { %1403 = vmatprep.subr.bf16.mxu0 %v1693_v0  ;;  %p1659_p10 = pnand %p1658_p9, %p1652_p6 }
  0xb9   :  { %1386 = vmatpush3.bf16.msra.mxu1 %v1505_v23 }
  0xba   :  { %1387 = vmatprep.subr.bf16.mxu1 %v1693_v0 }
  0xbb   :  { %1404 = vmatpush3.bf16.msra.mxu0 %v1512_v30 }
  0xbc   :  { %1405 = vmatprep.subr.bf16.mxu0 %v1693_v0 }
  0xbd   :  { %1388 = vmatpush3.bf16.msra.mxu1 %v1506_v24 }
  0xbe   :  { %1389 = vmatprep.subr.bf16.mxu1 %v1693_v0 }
  0xbf   :  { %1406 = vmatpush3.bf16.msra.mxu0 %v1513_v31 }
  0xc0   :  { %1407 = vmatprep.subr.bf16.mxu0 %v1693_v0 }
  0xc1   :  { %1390 = vmatpush3.bf16.msra.mxu1 %v1507_v25 }
  0xc2   :  { %1391 = vmatprep.subr.bf16.mxu1 %v1693_v0 }
  0xc3   :  { %1408 = vmatpush3.bf16.msra.mxu0 %v1514_v32 }
  0xc4   :  { %1409 = vmatprep.subr.bf16.mxu0 %v1693_v0 }
  0xc5   :  { %1392 = vmatpush3.bf16.msra.mxu1 %v1508_v26 }
  0xc6   :  { %1393 = vmatprep.subr.bf16.mxu1 %v1693_v0 }
  0xc7   :  { %1410 = vmatpush3.bf16.msra.mxu0 %v1515_v33 }
  0xc8   :  { %1411 = vmatprep.subr.bf16.mxu0 %v1693_v0 }
  0xc9   :  { %1394 = vmatpush3.bf16.msra.mxu1 %v1509_v27 }
  0xca   :  { %1395 = vmatprep.subr.bf16.mxu1 %v1693_v0 }
  0xcb   :  { %1412 = vmatpush3.bf16.msra.mxu0 %v1516_v34 }
  0xcc   :  { %1413 = vmatprep.subr.bf16.mxu0 %v1693_v0 }
  0xcd   :  { %1396 = vmatpush3.bf16.msra.mxu1 %v1510_v28 }
  0xcf   :  { %1414 = vmatpush3.bf16.msra.mxu0 %v1517_v14 }
  0xd0   :  { %1415 = vmatprep.subr.bf16.mxu0 %v1693_v0  ;;  %v1255_v0 = vld [vmem:[%s1888_s8] ss:$0 sm:$0xff] }
  0xd3   :  { %1416 = vmatpush3.bf16.msra.mxu0 %v1518_v15 }
 0x149   :  { %v313_v35 = vpop.f32.mrb[0].mxu0 }
 0x14a   :  { %v1379_v36 = vpop.f32.mrb[1].mxu0 }
 0x14b   :  { %v316_v37 = vpop.f32.mrb[2].mxu0 }
 0x14c   :  { %v1380_v38 = vpop.f32.mrb[3].mxu0 }
 0x162   :  { %v1283_v39 = vpop.f32.mrb[0].mxu1 }
 0x163   :  { %v1284_v40 = vpop.f32.mrb[1].mxu1 }
 0x164   :  { %v1285_v41 = vadd.f32 %v1284_v40, %v1283_v39  ;;  %v1286_v42 = vpop.f32.mrb[2].mxu1 }
 0x165   :  { %v1287_v43 = vpop.f32.mrb[3].mxu1 }
 0x166   :  { %v779_v44 = vadd.f32 %v1285_v41, %v313_v35  ;;  %v1288_v45 = vadd.f32 %v1287_v43, %v1286_v42 }
 0x168   :  { %v782_v46 = vadd.f32 %v1288_v45, %v316_v37 }
 0x169   :  { %v1305_v47 = vpop.f32.mrb[4].mxu0 }
 0x16a   :  { %v1306_v48 = vpop.f32.mrb[5].mxu0 }
 0x16b   :  { %v1307_v49 = vadd.f32 %v1306_v48, %v1305_v47  ;;  %v1308_v50 = vpop.f32.mrb[6].mxu0 }
 0x16c   :  { %v1309_v51 = vpop.f32.mrb[7].mxu0 }
 0x16d   :  { %v820_v52 = vadd.f32 %v1307_v49, %v779_v44  ;;  %v1310_v53 = vadd.f32 %v1309_v51, %v1308_v50 }
 0x16f   :  { %v823_v54 = vadd.f32 %v1310_v53, %v782_v46 }
 0x182   :  { %v1327_v55 = vpop.f32.mrb[4].mxu1 }
 0x183   :  { %v1328_v56 = vpop.f32.mrb[5].mxu1 }
 0x184   :  { %v1329_v57 = vadd.f32 %v1328_v56, %v1327_v55  ;;  %v1330_v58 = vpop.f32.mrb[6].mxu1 }
 0x185   :  { %v1331_v59 = vpop.f32.mrb[7].mxu1 }
 0x186   :  { %v861_v60 = vadd.f32 %v1329_v57, %v820_v52  ;;  %v1332_v61 = vadd.f32 %v1331_v59, %v1330_v58 }
 0x188   :  { %v864_v62 = vadd.f32 %v1332_v61, %v823_v54 }
 0x189   :  { %v1349_v63 = vpop.f32.mrb[8].mxu0 }
 0x18a   :  { %v1350_v1 = vpop.f32.mrb[9].mxu0 }
 0x18b   :  { %v1351_v2 = vadd.f32 %v1350_v1, %v1349_v63  ;;  %v1352_v3 = vpop.f32.mrb[10].mxu0 }
 0x18c   :  { %v1353_v5 = vpop.f32.mrb[11].mxu0 }
 0x18d   :  { %v902_v6 = vadd.f32 %v1351_v2, %v861_v60  ;;  %v1354_v7 = vadd.f32 %v1353_v5, %v1352_v3 }
 0x18f   :  { %v915_v8 = vadd.f32 %v1245_v4, %v902_v6  ;;  %v905_v9 = vadd.f32 %v1354_v7, %v864_v62 }
 0x191   :  { %v916_v10 = vadd.f32 %v1245_v4, %v905_v9  ;;  %v917_v11 = vmax.f32 %v915_v8, 0.0 }
 0x193   :  { %v918_v12 = vmax.f32 %v916_v10, 0.0 }
 0x195   :  { %v919_v13 = vpack.c.bf16 %v918_v12, %v917_v11 }
 0x197   :  { %1398 = vmatmul.mubr.bf16.vlgmr.msra.gmra.mrb[8].mxu1 %v919_v13 }
 0x26a   :  { %v1025_v17 = vpop.f32.mrb[8].mxu1 }
 0x26b   :  { %v1026_v18 = vadd.f32 %v1246_v16, %v1025_v17  ;;  %v1399_v19 = vpop.f32.mrb[9].mxu1 }
 0x26c   :  { %v1028_v20 = vpop.f32.mrb[10].mxu1 }
 0x26d   :  { %v1029_v21 = vadd.f32 %v1246_v16, %v1028_v20  ;;  %v1400_v22 = vpop.f32.mrb[11].mxu1  ;;  %v1032_v23 = vmax.f32 %v1026_v18, 0.0 }
 0x26f   :  { %v1033_v24 = vmax.f32 %v1029_v21, 0.0 }
 0x271   :  { %v1034_v25 = vpack.c.bf16 %v1033_v24, %v1032_v23 }
 0x273   :  { %1418 = vmatmul.mubr.bf16.vlgmr.msra.gmra.mrb[12].mxu0 %v1034_v25 }
 0x346   :  { %v1140_v26 = vpop.f32.mrb[12].mxu0 }
 0x347   :  { %v1141_v27 = vadd.f32 %v1255_v0, %v1140_v26  ;;  %v1419_v28 = vpop.f32.mrb[13].mxu0 }
 0x348   :  { %v1143_v29 = vpop.f32.mrb[14].mxu0 }
 0x349   :  { %1147 = vst [vmem:[#allocation13] sm:$0xff] %v1141_v27  ;;  %v1144_v30 = vadd.f32 %v1255_v0, %v1143_v29  ;;  %v1420_v31 = vpop.f32.mrb[15].mxu0 }
 0x34b   :  { %1148 = vst [vmem:[#allocation13 + $0x8] sm:$0xff] %v1144_v30 }
 0x34c   :  { %1662 = shalt.err (!%p1659_p10)
}
 0x34d   :  { %s1663_s25 = scalar_lea.hbm %s1889_s9, 256 }
 0x34e   :  { %p1664_p11 = scmp.ne.s32.totalorder %s1889_s9, %s1663_s25  ;;  %p1667_p12 = scmp.lt.u32.totalorder %s1663_s25, %s1889_s9 }
 0x350   :  { %p1669_p13 = pnand %p1667_p12, %p1664_p11 }
 0x352   :  { %1672 = shalt.err (!%p1669_p13)
}
 0x353   :  { %s1696_s2 = smov 128   ;;  %s1697_s29 = smov 8  }
 0x354   :  { %1160 = dma.vmem_to_hbm [thread:$0]  %s1155_s22, 256, %s1889_s9, [#allocation4], %s1696_s2, %s1696_s2, %s1697_s29  }
 0x355   :  { %1681 = dma.done.wait [#allocation4], 256  }
 0x356   :  { %1682 = vsyncadd [#allocation4], 4294967040 }
 0x357   :  { %1164 = vsyncpa [#allocation3], 1 }
 0x358   :  { %1165 = vsyncpa [#allocation6], 1 }
 0x359   :  { %1166 = vsyncpa [#allocation9], 1 }
 0x35a   :  { %1167 = vsyncpa [#allocation12], 1 }
 0x35b   :  { %1168 = vsyncpa [#allocation4], 1 }

</bundles_post_ra>
